<compile_context>
chip_gen: v5e
topology: v5e:2x2
jax: 0.10.0
libtpu: 0.0.40
codegen_flags: <defaults>
</compile_context>

<pallas_src>
import functools

import jax
import jax.numpy as jnp
from jax import lax
from jax.experimental import pallas as pl
from jax.experimental.pallas import tpu as pltpu


_EPS = 1e-5


def _h_swish(v):
    # h_swish(v) = v * relu6(v + 3) / 6   (pure VPU, no transcendentals)
    return v * jnp.clip(v + 3.0, 0.0, 6.0) * (1.0 / 6.0)


def _vmem_limit_bytes():
    """Generation-aware scoped-VMEM budget (~half of physical, capped at 64 MiB)."""
    try:
        cap = pltpu.get_tpu_info().vmem_capacity_bytes  # 64 MiB v7x, 128 MiB v5e/v6e
    except Exception:
        cap = 128 * 1024 * 1024
    return int(min(cap // 2, 64 * 1024 * 1024))


def _pick_tile_l(L, C, H, vmem_limit):
    """Largest TL (multiple of 256, <=2048) whose working set fits ~60% of the budget.

    Per-lane f32 bytes in the pipelined working set: 2x double-buffered x tile
    (C), 2x double-buffered out tile (C), and the (H, TL) h_swish intermediate.
    """
    per_lane = (2 * C + 2 * C + H) * 4
    budget = int(vmem_limit * 0.6)
    best = 128
    tl = 256
    while tl <= 2048:
        if tl * per_lane <= budget:
            best = tl
        tl += 256
    # whole (padded-to-128) sequence in one tile if it is small enough
    l_pad128 = max(128, ((L + 127) // 128) * 128)
    return l_pad128 if l_pad128 <= best else best


# ---------------------------------------------------------------- phase A ---
def _conv_stats_kernel(x_ref, w1_ref, b1_ref, w2_ref, b2_ref, stat_ref, *,
                       tile_l, valid_len, needs_mask):
    """Per-batch BN partial statistics of y = hsw(W2 @ hsw(W1 @ x)); no y writeback."""
    l = pl.program_id(1)

    @pl.when(l == 0)
    def _():
        stat_ref[...] = jnp.zeros_like(stat_ref)

    x = x_ref[...]                                               # (C, TL) f32
    # conv1: 1x1 conv == channel matmul on the MXU (bf16 operands, f32 acc)
    h = jnp.dot(w1_ref[...], x.astype(jnp.bfloat16),
                preferred_element_type=jnp.float32) + b1_ref[...]
    h = _h_swish(h)                                              # (H, TL) f32
    # TODO(synk): on v6e/v7x the bias + h_swish on (H, TL) could run in bf16
    #             (packed VPU); kept f32 so the same kernel stays correct on v5e.
    y = jnp.dot(w2_ref[...], h.astype(jnp.bfloat16),
                preferred_element_type=jnp.float32) + b2_ref[...]
    y = _h_swish(y)                                              # (C, TL) f32

    if needs_mask:
        lane = lax.broadcasted_iota(jnp.int32, y.shape, 1) + l * tile_l
        y = jnp.where(lane < valid_len, y, 0.0)

    s = jnp.sum(y, axis=1, keepdims=True)                        # (C, 1)
    sq = jnp.sum(y * y, axis=1, keepdims=True)                   # (C, 1)
    stat_ref[...] += jnp.concatenate([s, sq], axis=1)            # (C, 2) resident acc


# ---------------------------------------------------------------- phase B ---
def _conv_bn_residual_kernel(x_ref, w1_ref, b1_ref, w2_ref, b2_ref,
                             scale_ref, shift_ref, o_ref):
    """Recompute y, then out = x + y*scale + shift (BN folded into scale/shift)."""
    x = x_ref[...]
    h = _h_swish(jnp.dot(w1_ref[...], x.astype(jnp.bfloat16),
                         preferred_element_type=jnp.float32) + b1_ref[...])
    y = _h_swish(jnp.dot(w2_ref[...], h.astype(jnp.bfloat16),
                         preferred_element_type=jnp.float32) + b2_ref[...])
    o_ref[...] = x + y * scale_ref[...] + shift_ref[...]


def conv_projection_forward(x, w1, b1, w2, b2, gamma, beta):
    """x: (N, C, L) f32.  w1: (H, C), b1: (H,), w2: (C, H), b2/gamma/beta: (C,)."""
    N, C, L = x.shape
    H = w1.shape[0]

    vmem_limit = _vmem_limit_bytes()
    TL = _pick_tile_l(L, C, H, vmem_limit)
    L_pad = ((L + TL - 1) // TL) * TL
    needs_mask = L_pad != L
    x_in = jnp.pad(x, ((0, 0), (0, 0), (0, L_pad - L))) if needs_mask else x
    nLT = L_pad // TL
    R = N * L  # true element count per channel (padded lanes masked out of stats)

    w1_b = w1.astype(jnp.bfloat16)
    w2_b = w2.astype(jnp.bfloat16)
    b1_c = b1.reshape(H, 1).astype(jnp.float32)
    b2_c = b2.reshape(C, 1).astype(jnp.float32)

    const2 = lambda n, l: (0, 0)
    tile_spec = pl.BlockSpec((None, C, TL), lambda n, l: (n, 0, l))
    weight_specs = [pl.BlockSpec((H, C), const2),
                    pl.BlockSpec((H, 1), const2),
                    pl.BlockSpec((C, H), const2),
                    pl.BlockSpec((C, 1), const2)]

    matmul_flops = 4 * N * L_pad * C * H  # two 1x1-conv matmuls

    # --- phase A: fused convs + h_swish, per-batch BN partial stats only -----
    stats = pl.pallas_call(
        functools.partial(_conv_stats_kernel,
                          tile_l=TL, valid_len=L, needs_mask=needs_mask),
        grid=(N, nLT),
        in_specs=[tile_spec] + weight_specs,
        out_specs=pl.BlockSpec((None, C, 2), lambda n, l: (n, 0, 0)),
        out_shape=jax.ShapeDtypeStruct((N, C, 2), jnp.float32),
        compiler_params=pltpu.CompilerParams(
            dimension_semantics=("parallel", "arbitrary"),
            vmem_limit_bytes=vmem_limit),
        cost_estimate=pl.CostEstimate(
            flops=matmul_flops, transcendentals=0,
            bytes_accessed=4 * N * C * L_pad + 8 * N * C),
    )(x_in, w1_b, b1_c, w2_b, b2_c)

    # --- tiny JAX-level reduce: biased batch statistics -> scale/shift -------
    s = jnp.sum(stats[:, :, 0], axis=0)                  # (C,)
    ss = jnp.sum(stats[:, :, 1], axis=0)                 # (C,)
    mean = s / R
    var = jnp.maximum(ss / R - mean * mean, 0.0)         # clamp f32 cancellation
    inv_std = lax.rsqrt(var + _EPS)
    scale = (gamma * inv_std).reshape(C, 1).astype(jnp.float32)
    shift = (beta - mean * gamma * inv_std).reshape(C, 1).astype(jnp.float32)

    # --- phase B: recompute y, normalize + affine + residual -----------------
    out = pl.pallas_call(
        _conv_bn_residual_kernel,
        grid=(N, nLT),
        in_specs=[tile_spec] + weight_specs + [pl.BlockSpec((C, 1), const2),
                                               pl.BlockSpec((C, 1), const2)],
        out_specs=tile_spec,
        out_shape=jax.ShapeDtypeStruct((N, C, L_pad), jnp.float32),
        compiler_params=pltpu.CompilerParams(
            dimension_semantics=("parallel", "parallel"),
            vmem_limit_bytes=vmem_limit),
        cost_estimate=pl.CostEstimate(
            flops=matmul_flops, transcendentals=0,
            bytes_accessed=8 * N * C * L_pad),
    )(x_in, w1_b, b1_c, w2_b, b2_c, scale, shift)

    return out[:, :, :L] if needs_mask else out


# ------------------------------------------------------------------ helpers -
def init_params(key, in_channels, conv_ratio):
    """Mimic PyTorch Conv1d default init (U[-1/sqrt(fan_in), 1/sqrt(fan_in)])."""
    C = in_channels
    H = in_channels * conv_ratio
    k1, k2, k3, k4 = jax.random.split(key, 4)

    bound1 = 1.0 / jnp.sqrt(C * 1.0)   # conv1 fan_in = C * kernel_size(1)
    bound2 = 1.0 / jnp.sqrt(H * 1.0)   # conv2 fan_in = H * kernel_size(1)

    # PyTorch Conv1d weight layout (out, in) with kernel_size=1 squeezed
    w1 = jax.random.uniform(k1, (H, C), jnp.float32, -bound1, bound1)
    b1 = jax.random.uniform(k2, (H,), jnp.float32, -bound1, bound1)
    w2 = jax.random.uniform(k3, (C, H), jnp.float32, -bound2, bound2)
    b2 = jax.random.uniform(k4, (C,), jnp.float32, -bound2, bound2)

    gamma = jnp.ones((C,), jnp.float32)   # BatchNorm1d weight
    beta = jnp.zeros((C,), jnp.float32)   # BatchNorm1d bias
    return w1, b1, w2, b2, gamma, beta


def _reference(x, w1, b1, w2, b2, gamma, beta):
    """Pure-JAX f32 reference of the PyTorch forward (training-mode BN)."""
    h = jnp.einsum("hc,ncl->nhl", w1, x) + b1[None, :, None]
    h = _h_swish(h)
    y = jnp.einsum("ch,nhl->ncl", w2, h) + b2[None, :, None]
    y = _h_swish(y)
    mean = jnp.mean(y, axis=(0, 2), keepdims=True)
    var = jnp.mean((y - mean) ** 2, axis=(0, 2), keepdims=True)
    yn = (y - mean) * lax.rsqrt(var + _EPS)
    return x + yn * gamma[None, :, None] + beta[None, :, None]


if __name__ == "__main__":
    key = jax.random.PRNGKey(0)
    kx, kp = jax.random.split(key)

    N, C, L = 2, 8, 16        # batch, in_channels, sequence length
    conv_ratio = 4            # hidden = 32

    x = jax.random.normal(kx, (N, C, L), jnp.float32)
    params = init_params(kp, C, conv_ratio)

    out = conv_projection_forward(x, *params)
    out = jax.block_until_ready(out)

    assert out.shape == (N, C, L) and out.dtype == jnp.float32
    assert bool(jnp.all(jnp.isfinite(out)))
    # loose sanity check vs f32 reference (kernel matmuls use bf16 operands)
    ref = _reference(x, *params)
    assert float(jnp.max(jnp.abs(out - ref))) < 0.5
    print("KERNEL_OK")
</pallas_src>

<mosaic_0001>
module attributes {stable_mosaic.version = 11 : i64} {
  func.func @_conv_stats_kernel(%arg0: i32, %arg1: i32, %arg2: memref<1x8x128xf32, #tpu.memory_space<vmem>>, %arg3: memref<32x8xbf16, #tpu.memory_space<vmem>>, %arg4: memref<32x1xf32, #tpu.memory_space<vmem>>, %arg5: memref<8x32xbf16, #tpu.memory_space<vmem>>, %arg6: memref<8x1xf32, #tpu.memory_space<vmem>>, %arg7: memref<1x8x2xf32, #tpu.memory_space<vmem>>) attributes {dimension_semantics = [#tpu.dimension_semantics<parallel>, #tpu.dimension_semantics<arbitrary>], iteration_bounds = array<i64: 2, 1>, scalar_prefetch = 0 : i64, scratch_operands = 0 : i64, tpu.core_type = #tpu.core_type<tc>, window_params = [{transform_indices = @transform_0, window_bounds = array<i64: 1, 8, 128>}, {pipeline_mode = #tpu.pipeline_mode<synchronous>, transform_indices = @transform_1, window_bounds = array<i64: 32, 8>}, {pipeline_mode = #tpu.pipeline_mode<synchronous>, transform_indices = @transform_2, window_bounds = array<i64: 32, 1>}, {pipeline_mode = #tpu.pipeline_mode<synchronous>, transform_indices = @transform_3, window_bounds = array<i64: 8, 32>}, {pipeline_mode = #tpu.pipeline_mode<synchronous>, transform_indices = @transform_4, window_bounds = array<i64: 8, 1>}, {transform_indices = @transform_5, window_bounds = array<i64: 1, 8, 2>}]} {
    %c0_i32 = arith.constant 0 : i32
    %0 = arith.cmpi eq, %arg1, %c0_i32 : i32
    %1 = arith.extui %0 : i1 to i32
    %c0_i32_0 = arith.constant 0 : i32
    %2 = arith.cmpi ne, %1, %c0_i32_0 : i32
    scf.if %2 {
      %cst_29 = arith.constant 0.000000e+00 : f32
      %55 = vector.broadcast %cst_29 : f32 to vector<8x2xf32>
      %c0_30 = arith.constant 0 : index
      %c0_31 = arith.constant 0 : index
      %c0_32 = arith.constant 0 : index
      %56 = vector.load %arg7[%c0_30, %c0_31, %c0_32] : memref<1x8x2xf32, #tpu.memory_space<vmem>>, vector<1x8x2xf32>
      %57 = vector.shape_cast %56 : vector<1x8x2xf32> to vector<8x2xf32>
      %58 = vector.shape_cast %55 : vector<8x2xf32> to vector<1x8x2xf32>
      tpu.vector_store %arg7[%c0_30, %c0_31, %c0_32], %58 {strides = array<i32>} : memref<1x8x2xf32, #tpu.memory_space<vmem>>, vector<1x8x2xf32>,
    } else {
    }
    %c0 = arith.constant 0 : index
    %c0_1 = arith.constant 0 : index
    %c0_2 = arith.constant 0 : index
    %3 = vector.load %arg2[%c0, %c0_1, %c0_2] : memref<1x8x128xf32, #tpu.memory_space<vmem>>, vector<1x8x128xf32>
    %4 = vector.shape_cast %3 : vector<1x8x128xf32> to vector<8x128xf32>
    %c0_3 = arith.constant 0 : index
    %c0_4 = arith.constant 0 : index
    %5 = vector.load %arg3[%c0_3, %c0_4] : memref<32x8xbf16, #tpu.memory_space<vmem>>, vector<32x8xbf16>
    %6 = arith.truncf %4 : vector<8x128xf32> to vector<8x128xbf16>
    %cst = arith.constant dense<0.000000e+00> : vector<32x128xf32>
    %7 = tpu.matmul %5, %6, %cst {dimension_numbers = #tpu.dot_dimension_numbers<[1], [0], [0], [1], [0, 0, 1, 1], [], []>} : vector<32x8xbf16>, vector<8x128xbf16>, vector<32x128xf32> -> vector<32x128xf32>
    %c0_5 = arith.constant 0 : index
    %c0_6 = arith.constant 0 : index
    %8 = vector.load %arg4[%c0_5, %c0_6] : memref<32x1xf32, #tpu.memory_space<vmem>>, vector<32x1xf32>
    %9 = vector.broadcast %8 : vector<32x1xf32> to vector<32x128xf32>
    %10 = arith.addf %7, %9 : vector<32x128xf32>
    %cst_7 = arith.constant 3.000000e+00 : f32
    %11 = vector.broadcast %cst_7 : f32 to vector<32x128xf32>
    %12 = arith.addf %10, %11 : vector<32x128xf32>
    %cst_8 = arith.constant 0.000000e+00 : f32
    %cst_9 = arith.constant 6.000000e+00 : f32
    %13 = vector.broadcast %cst_8 : f32 to vector<32x128xf32>
    %14 = arith.maximumf %13, %12 : vector<32x128xf32>
    %15 = vector.broadcast %cst_9 : f32 to vector<32x128xf32>
    %16 = arith.minimumf %15, %14 : vector<32x128xf32>
    %17 = arith.mulf %10, %16 : vector<32x128xf32>
    %cst_10 = arith.constant 0.166666672 : f32
    %18 = vector.broadcast %cst_10 : f32 to vector<32x128xf32>
    %19 = arith.mulf %17, %18 : vector<32x128xf32>
    %c0_11 = arith.constant 0 : index
    %c0_12 = arith.constant 0 : index
    %20 = vector.load %arg5[%c0_11, %c0_12] : memref<8x32xbf16, #tpu.memory_space<vmem>>, vector<8x32xbf16>
    %21 = arith.truncf %19 : vector<32x128xf32> to vector<32x128xbf16>
    %cst_13 = arith.constant dense<0.000000e+00> : vector<8x128xf32>
    %22 = tpu.matmul %20, %21, %cst_13 {dimension_numbers = #tpu.dot_dimension_numbers<[1], [0], [0], [1], [0, 0, 1, 1], [], []>} : vector<8x32xbf16>, vector<32x128xbf16>, vector<8x128xf32> -> vector<8x128xf32>
    %c0_14 = arith.constant 0 : index
    %c0_15 = arith.constant 0 : index
    %23 = vector.load %arg6[%c0_14, %c0_15] : memref<8x1xf32, #tpu.memory_space<vmem>>, vector<8x1xf32>
    %24 = vector.broadcast %23 : vector<8x1xf32> to vector<8x128xf32>
    %25 = arith.addf %22, %24 : vector<8x128xf32>
    %cst_16 = arith.constant 3.000000e+00 : f32
    %26 = vector.broadcast %cst_16 : f32 to vector<8x128xf32>
    %27 = arith.addf %25, %26 : vector<8x128xf32>
    %cst_17 = arith.constant 0.000000e+00 : f32
    %cst_18 = arith.constant 6.000000e+00 : f32
    %28 = vector.broadcast %cst_17 : f32 to vector<8x128xf32>
    %29 = arith.maximumf %28, %27 : vector<8x128xf32>
    %30 = vector.broadcast %cst_18 : f32 to vector<8x128xf32>
    %31 = arith.minimumf %30, %29 : vector<8x128xf32>
    %32 = arith.mulf %25, %31 : vector<8x128xf32>
    %cst_19 = arith.constant 0.166666672 : f32
    %33 = vector.broadcast %cst_19 : f32 to vector<8x128xf32>
    %34 = arith.mulf %32, %33 : vector<8x128xf32>
    %35 = tpu.iota {dimensions = array<i32: 1>} : vector<8x128xi32>
    %c128_i32 = arith.constant 128 : i32
    %36 = arith.muli %arg1, %c128_i32 : i32
    %37 = vector.broadcast %36 : i32 to vector<8x128xi32>
    %38 = arith.addi %35, %37 : vector<8x128xi32>
    %c16_i32 = arith.constant 16 : i32
    %39 = vector.broadcast %c16_i32 : i32 to vector<8x128xi32>
    %40 = arith.cmpi slt, %38, %39 : vector<8x128xi32>
    %cst_20 = arith.constant 0.000000e+00 : f32
    %41 = vector.broadcast %cst_20 : f32 to vector<8x128xf32>
    %42 = arith.select %40, %34, %41 : vector<8x128xi1>, vector<8x128xf32>
    %cst_21 = arith.constant dense<0.000000e+00> : vector<8xf32>
    %43 = vector.multi_reduction <add>, %42, %cst_21 [1] : vector<8x128xf32> to vector<8xf32>
    %44 = vector.shape_cast %43 : vector<8xf32> to vector<8x1xf32>
    %45 = arith.mulf %42, %42 : vector<8x128xf32>
    %cst_22 = arith.constant dense<0.000000e+00> : vector<8xf32>
    %46 = vector.multi_reduction <add>, %45, %cst_22 [1] : vector<8x128xf32> to vector<8xf32>
    %47 = vector.shape_cast %46 : vector<8xf32> to vector<8x1xf32>
    %c0_23 = arith.constant 0 : index
    %c0_24 = arith.constant 0 : index
    %c0_25 = arith.constant 0 : index
    %48 = vector.load %arg7[%c0_23, %c0_24, %c0_25] : memref<1x8x2xf32, #tpu.memory_space<vmem>>, vector<1x8x2xf32>
    %49 = vector.shape_cast %48 : vector<1x8x2xf32> to vector<8x2xf32>
    %50 = tpu.concatenate %44, %47 in 1 : vector<8x1xf32>, vector<8x1xf32> -> vector<8x2xf32>
    %51 = arith.addf %49, %50 : vector<8x2xf32>
    %c0_26 = arith.constant 0 : index
    %c0_27 = arith.constant 0 : index
    %c0_28 = arith.constant 0 : index
    %52 = vector.load %arg7[%c0_26, %c0_27, %c0_28] : memref<1x8x2xf32, #tpu.memory_space<vmem>>, vector<1x8x2xf32>
    %53 = vector.shape_cast %52 : vector<1x8x2xf32> to vector<8x2xf32>
    %54 = vector.shape_cast %51 : vector<8x2xf32> to vector<1x8x2xf32>
    tpu.vector_store %arg7[%c0_26, %c0_27, %c0_28], %54 {strides = array<i32>} : memref<1x8x2xf32, #tpu.memory_space<vmem>>, vector<1x8x2xf32>,
    return
  }
  func.func @transform_0(%arg0: i32, %arg1: i32) -> (i32, i32, i32) {
    %c0_i32 = arith.constant 0 : i32
    %c0_i32_0 = arith.constant 0 : i32
    return %arg0, %c0_i32, %arg1 : i32, i32, i32
  }
  func.func @transform_1(%arg0: i32, %arg1: i32) -> (i32, i32) {
    %c0_i32 = arith.constant 0 : i32
    %c0_i32_0 = arith.constant 0 : i32
    %c0_i32_1 = arith.constant 0 : i32
    return %c0_i32, %c0_i32_0 : i32, i32
  }
  func.func @transform_2(%arg0: i32, %arg1: i32) -> (i32, i32) {
    %c0_i32 = arith.constant 0 : i32
    %c0_i32_0 = arith.constant 0 : i32
    %c0_i32_1 = arith.constant 0 : i32
    return %c0_i32, %c0_i32_0 : i32, i32
  }
  func.func @transform_3(%arg0: i32, %arg1: i32) -> (i32, i32) {
    %c0_i32 = arith.constant 0 : i32
    %c0_i32_0 = arith.constant 0 : i32
    %c0_i32_1 = arith.constant 0 : i32
    return %c0_i32, %c0_i32_0 : i32, i32
  }
  func.func @transform_4(%arg0: i32, %arg1: i32) -> (i32, i32) {
    %c0_i32 = arith.constant 0 : i32
    %c0_i32_0 = arith.constant 0 : i32
    %c0_i32_1 = arith.constant 0 : i32
    return %c0_i32, %c0_i32_0 : i32, i32
  }
  func.func @transform_5(%arg0: i32, %arg1: i32) -> (i32, i32, i32) {
    %c0_i32 = arith.constant 0 : i32
    %c0_i32_0 = arith.constant 0 : i32
    %c0_i32_1 = arith.constant 0 : i32
    return %arg0, %c0_i32, %c0_i32_0 : i32, i32, i32
  }
}

</mosaic_0001>

<bundles_post_ra>
// kernel: tpu_custom_call.1
= control target key start
LH: loop header
LB: loop body
LE: loop exit
PB: predicated region body
PF: predicated region fallthrough
CT: control target
= control target key end

     0   :  { %s561_s18 = smov 0   ;;  %s563_s19 = smov 0   ;;  %s625_s0 = inlined_call_operand.vmem [shape: f32[2,8,128], index: 0, kind: input, shape index: {}]   ;;  %s626_s1 = inlined_call_operand.vmem [shape: bf16[32,8], index: 1, kind: input, shape index: {}]   ;;  %s627_s2 = inlined_call_operand.vmem [shape: f32[32,1], index: 2, kind: input, shape index: {}]   ;;  %s628_s3 = inlined_call_operand.vmem [shape: bf16[8,32], index: 3, kind: input, shape index: {}]   ;;  %s629_s4 = inlined_call_operand.vmem [shape: f32[8,1], index: 4, kind: input, shape index: {}]   ;;  %s630_s5 = inlined_call_operand.vmem [shape: f32[2,8,2], index: 5, kind: output, shape index: {}]  }
   0x1   :  { %s565_s20 = smov 0  }
   0x2 LB: > { %s27_s21 = sadd.s32 1, %s523_s19  ;;  %p457_p0 = scmp.ge.s32.totalorder %s527_s20, 1  ;;  %s527_s20 = sphi %s565_s20, %s15_s20   ;;  %s523_s19 = sphi %s563_s19, %s632_s19   ;;  %s519_s18 = sphi %s561_s18, %s631_s18  }
   0x3   : > { %p29_p1 = scmp.ge.s32.totalorder %s27_s21, 2  ;;  %p203_p2 = scmp.lt.s32.totalorder %s527_s20, 3 }
   0x5   : > { %s634_s21 = smov (%p29_p1, %s27_s21), 0  ;;  %p204_p3 = pnand %p457_p0, %p203_p2 }
   0x6   : > { %p232_p4 = scmp.lt.s32.totalorder (!%p204_p3), %s519_s18, 1 }
   0x7   : > { %207 = sbr.rel (%p204_p3) target bundleno = 445 (0x1bd), region = 40 }
   0xc   : > { %v258_v0 = vld [vmem:[%s627_s2 + $0x10] sm:$0xff]  ;;  %v256_v1 = vld [vmem:[%s627_s2] sm:$0xff]  ;;  %s636_s18 = smov (!%p232_p4, %s519_s18), 1  ;;  %v529_v2 = vmov 0   ;;  %vm248_vm0 = vcmask 15360   ;;  %v530_v3 = vmov 0.0   ;;  %v371_v50 = vlaneseq }
   0xd   : > { %502 = vset.pattern.permute.xlu0 %v529_v2  ;;  %503 = vset.pattern.permute.xlu1 %v529_v2  ;;  %s458_s26 = sshll.u32 %s636_s18, 3  ;;  %vm297_vm1 = vcmask 1043456   ;;  %v259_v6 = vld [vmem:[%s627_s2 + $0x18] sm:$0xff]  ;;  %v257_v7 = vld [vmem:[%s627_s2 + $0x8] sm:$0xff]  ;;  %v473_v9 = vld [vmem:[%s626_s1] sm:$0xff]  ;;  %vm290_vm2 = vcmask 64512  }
   0xe   : > { %272 = vperm.xlu0 %502, %v258_v0   ;;  %262 = vperm.xlu1 %503, %v256_v1   ;;  %s238_s29 = scalar_lea.vmem %s625_s0, %s458_s26  ;;  %s591_s7 = scalar_lea.vmem %s630_s5, %s458_s26  ;;  %v474_v10 = vld [vmem:[%s626_s1 + $0x8] sm:$0xff]  ;;  %v343_v14 = vld [vmem:[%s629_s4] sm:$0xff]  ;;  %vm349_vm3 = vcmask 261120   ;;  %v372_v53 = vand.u32 127, %v371_v50  ;;  %vm384_vm5 = vcmask 7168  }
   0xf   : > { %504 = vset.pattern.permute.xlu2 %v529_v2  ;;  %249 = vst.msk [vmem:[%s591_s7] sm:$0xff] %vm248_vm0, %v530_v3  ;;  %v250_v4 = vld [vmem:[%s238_s29] sm:$0xff] }
  0x10   : > { %v255_v5 = vpack.c.bf16 %v250_v4, %v250_v4  ;;  %346 = vperm.xlu2 %504, %v343_v14   ;;  %v340_v46 = vld [vmem:[%s628_s3] sm:$0xf]  ;;  %vm376_vm4 = vcmp.lt.s32.totalorder %v372_v53, 16 }
  0x12   : > { %v299_v8 = vsel %vm297_vm1, %v255_v5, 0 }
  0x13   : > { %308 = vmatpush.bf16.msra.mxu0 %v299_v8  ;;  %475 = vmatpush.bf16.msra.mxu2 %v299_v8 }
  0x16   : > { %277 = vperm.xlu0 %502, %v259_v6   ;;  %267 = vperm.xlu1 %503, %v257_v7   ;;  %v383_v60 = vld [vmem:[%s591_s7] sm:$0xff] }
  0x17   : > { %468 = vmatmul.msk.bf16.vlgmr.msra.gmra.mxu0 %vm290_vm2, %v473_v9  ;;  %469 = vmatmul.msk.bf16.vlgmr.msra.gmra.mxu2 %vm290_vm2, %v474_v10 }
  0x6a   : > { %v347_v47 = vpop.permute.xlu2 %346 }
  0x80   : > { %v263_v11 = vpop.permute.xlu1 %262  ;;  %v273_v13 = vpop.permute.xlu0 %272 }
  0x88   : > { %v268_v16 = vpop.permute.xlu1 %267  ;;  %v278_v25 = vpop.permute.xlu0 %277 }
  0x94   : > { %v310_v12 = vpop.f32.mrf.mxu0 }
  0x95   : > { %v311_v19 = vadd.f32 %v310_v12, %v263_v11 }
  0x97   : > { %v320_v23 = vadd.f32 3.0, %v311_v19 }
  0x99   : > { %v324_v29 = vmax.f32 %v320_v23, 0.0 }
  0x9a   : > { %v315_v15 = vpop.f32.mrf.mxu2 }
  0x9b   : > { %v316_v17 = vadd.f32 %v315_v15, %v273_v13  ;;  %v328_v34 = vmin.f32 %v324_v29, 6.0 }
  0x9c   : > { %v312_v18 = vpop.f32.mrf.mxu0 }
  0x9d   : > { %v322_v20 = vadd.f32 3.0, %v316_v17  ;;  %v313_v21 = vadd.f32 %v312_v18, %v268_v16  ;;  %v332_v39 = vmul.f32 %v328_v34, %v311_v19 }
  0x9f   : > { %v321_v22 = vadd.f32 3.0, %v313_v21  ;;  %v326_v24 = vmax.f32 %v322_v20, 0.0  ;;  %v336_v44 = vmul.f32 0.16666667, %v332_v39 }
  0xa1   : > { %v325_v27 = vmax.f32 %v321_v22, 0.0  ;;  %v330_v30 = vmin.f32 %v326_v24, 6.0 }
  0xa2   : > { %v317_v26 = vpop.f32.mrf.mxu2 }
  0xa3   : > { %v318_v28 = vadd.f32 %v317_v26, %v278_v25  ;;  %v329_v32 = vmin.f32 %v325_v27, 6.0  ;;  %v334_v36 = vmul.f32 %v330_v30, %v316_v17 }
  0xa5   : > { %v323_v31 = vadd.f32 3.0, %v318_v28  ;;  %v333_v37 = vmul.f32 %v329_v32, %v313_v21  ;;  %v338_v40 = vmul.f32 0.16666667, %v334_v36 }
  0xa7   : > { %v327_v33 = vmax.f32 %v323_v31, 0.0  ;;  %v337_v42 = vmul.f32 0.16666667, %v333_v37 }
  0xa9   : > { %v331_v35 = vmin.f32 %v327_v33, 6.0  ;;  %v341_v45 = vpack.c.bf16 %v337_v42, %v336_v44 }
  0xab   : > { %v335_v38 = vmul.f32 %v331_v35, %v318_v28 }
  0xad   : > { %v339_v41 = vmul.f32 0.16666667, %v335_v38 }
  0xaf   : > { %v342_v43 = vpack.c.bf16 %v339_v41, %v338_v40 }
  0xb1   : > { %359 = vmatpush.bf16.msra.mxu1 %v342_v43 }
  0xb5   : > { %360 = vmatpush.bf16.msra.mxu1 %v341_v45 }
  0xb8   : > { %470 = vmatmul.msk.bf16.vlgmr.msra.gmra.mxu1 %vm349_vm3, %v340_v46 }
 0x135   : > { %v362_v48 = vpop.f32.mrf.mxu1 }
 0x136   : > { %v363_v49 = vadd.f32 %v362_v48, %v347_v47 }
 0x138   : > { %v366_v51 = vadd.f32 3.0, %v363_v49 }
 0x13a   : > { %v367_v52 = vmax.f32 %v366_v51, 0.0 }
 0x13c   : > { %v368_v54 = vmin.f32 %v367_v52, 6.0 }
 0x13d   : > { %v364_v55 = vpop.f32.mrf.mxu1 }
 0x13e   : > { %v369_v56 = vmul.f32 %v368_v54, %v363_v49 }
 0x140   : > { %v370_v57 = vmul.f32 0.16666667, %v369_v56 }
 0x142   : > { %v377_v58 = vsel %vm376_vm4, %v370_v57, 0.0 }
 0x143   : > { %378 = vadd.xlane.f32.xlu2 %v377_v58  ;;  %v380_v59 = vmul.f32 %v377_v58, %v377_v58 }
 0x145   : > { %381 = vadd.xlane.f32.xlu0 %v380_v59 }
 0x1b6   : > { %v379_v61 = vpop.xlane.xlu2 %378 }
 0x1b8   : > { %v382_v62 = vpop.xlane.xlu0 %381 }
 0x1b9   : > { %v385_v63 = vsel %vm384_vm5, %v379_v61, %v382_v62 }
 0x1ba   : > { %v386_v0 = vadd.f32 %v385_v63, %v383_v60 }
 0x1bc   : > { %388 = vst.msk [vmem:[%s591_s7] sm:$0xff] %vm248_vm0, %v386_v0 }
 0x1bd PF: > { %s15_s20 = sadd.s32 1, %s527_s20   ;;  %s631_s18 = smov %s523_s19 }
 0x1be   : > { %p12_p5 = scmp.ge.s32.totalorder %s15_s20, 4   ;;  %s632_s19 = smov %s634_s21 }
 0x1c0   :  { %14 = sbr.rel (!%p12_p5) target bundleno = 2 (0x2), region = 74 }

</bundles_post_ra>
